<compile_context>
chip_gen: v5e
topology: v5e:2x2
jax: 0.10.0
libtpu: 0.0.40
codegen_flags: <defaults>
</compile_context>

<pallas_src>
import functools

import jax
import jax.numpy as jnp
from jax import lax
from jax.experimental import pallas as pl
from jax.experimental.pallas import tpu as pltpu

PI = 3.1415926535


# --------------------------------------------------------------------------
# Kernel 1: mean cross-entropy over the batch (tiled over N, no one-hot).
# --------------------------------------------------------------------------
def _ce_kernel(labels_ref, logits_ref, out_ref, *, n_total):
    i = pl.program_id(0)

    @pl.when(i == 0)
    def _():
        out_ref[...] = jnp.zeros_like(out_ref)

    x = logits_ref[...].astype(jnp.float32)                       # (TN, C)
    lab = labels_ref[...]                                         # (TN, 1) i32
    cls = lax.broadcasted_iota(jnp.int32, x.shape, 1)              # (TN, C)
    picked = jnp.sum(jnp.where(cls == lab, x, 0.0), axis=1, keepdims=True)
    m = jnp.max(x, axis=1, keepdims=True)
    lse = m + jnp.log(jnp.sum(jnp.exp(x - m), axis=1, keepdims=True))
    row = lax.broadcasted_iota(jnp.int32, (x.shape[0], 1), 0) + i * x.shape[0]
    contrib = jnp.where(row < n_total, lse - picked, 0.0)          # mask pad rows
    out_ref[...] += jnp.sum(contrib, keepdims=True) / float(n_total)


def cross_entropy_pallas(logits, labels):
    n, c = logits.shape
    tn = n if n <= 1024 else 256                                   # batch tile
    grid = (pl.cdiv(n, tn),)
    labels2 = labels.reshape(n, 1).astype(jnp.int32)
    out = pl.pallas_call(
        functools.partial(_ce_kernel, n_total=n),
        out_shape=jax.ShapeDtypeStruct((1, 1), jnp.float32),
        grid=grid,
        in_specs=[pl.BlockSpec((tn, 1), lambda i: (i, 0)),
                  pl.BlockSpec((tn, c), lambda i: (i, 0))],
        out_specs=pl.BlockSpec((1, 1), lambda i: (0, 0)),
        compiler_params=pltpu.CompilerParams(
            dimension_semantics=("arbitrary",)),
    )(labels2, logits)
    return out[0, 0]


# --------------------------------------------------------------------------
# Kernel 2: per-output-filter cosine vs. the per-input-channel mean filter
#           for a stack of same-shape 4-D conv weights.
#   input  : (P, K, I, O)  (K = KH*KW taps leading, output channels on lanes)
#   output : (P, 1, O)     lane-dense per-filter cos
# --------------------------------------------------------------------------
def _conv_angle_kernel(w_ref, cos_ref):
    w = w_ref[0]                                           # (K, I, O)
    k, _, o_ch = w.shape
    s = jnp.sum(w, axis=0)                                 # (I, O) per-(i,o) tap sums
    normsq = jnp.sum(jnp.sum(w * w, axis=0), axis=0, keepdims=True)   # (1, O)
    c = jnp.sum(s, axis=1, keepdims=True)                  # (I, 1) = sum_{o,k} w
    inv_ok = 1.0 / float(o_ch * k)
    dot = jnp.sum(s * c, axis=0, keepdims=True) * inv_ok   # (1, O) = <w_o, mean>
    mean_normsq = float(k) * inv_ok * inv_ok * jnp.sum(c * c, keepdims=True)  # (1,1)
    cos_ref[0] = dot / (jnp.sqrt(normsq) * jnp.sqrt(mean_normsq) + 1e-8)


def conv_angle_cos_pallas(stacked):
    p, k, i, o = stacked.shape
    cos = pl.pallas_call(
        _conv_angle_kernel,
        out_shape=jax.ShapeDtypeStruct((p, 1, o), jnp.float32),
        grid=(p,),
        in_specs=[pl.BlockSpec((1, k, i, o), lambda j: (j, 0, 0, 0))],
        out_specs=pl.BlockSpec((1, 1, o), lambda j: (j, 0, 0)),
        compiler_params=pltpu.CompilerParams(
            dimension_semantics=("parallel",)),
    )(stacked)
    return cos[:, 0, :]                                    # (P, O)


# --------------------------------------------------------------------------
# Kernel 3: all FilterSkeleton statistics for a stack of same-shape weights.
#   input  : (P, HW, N)   (taps on sublanes, filters on lanes)
#   outputs: cos (P,1,N), per-filter |.|-sum (P,1,N), per-filter sq-norm (P,1,N)
#   (totals sum-of-squares / sum-of-abs are derived from these in glue.)
# --------------------------------------------------------------------------
def _fs_stats_kernel(w_ref, cos_ref, rowabs_ref, normsq_ref):
    w = w_ref[0]                                           # (HW, N)
    wsq = w * w
    normsq = jnp.sum(wsq, axis=0, keepdims=True)           # (1, N)
    m = jnp.sum(w, axis=1, keepdims=True) / float(w.shape[1])   # (HW, 1) mean over filters
    dot = jnp.sum(w * m, axis=0, keepdims=True)            # (1, N)
    mean_normsq = jnp.sum(m * m, keepdims=True)            # (1, 1)
    cos_ref[0] = dot / (jnp.sqrt(normsq) * jnp.sqrt(mean_normsq) + 1e-7)
    rowabs_ref[0] = jnp.sum(jnp.abs(w), axis=0, keepdims=True)   # (1, N)
    normsq_ref[0] = normsq


def fs_stats_pallas(stacked):
    p, hw, n = stacked.shape
    cos, rowabs, normsq = pl.pallas_call(
        _fs_stats_kernel,
        out_shape=(jax.ShapeDtypeStruct((p, 1, n), jnp.float32),
                   jax.ShapeDtypeStruct((p, 1, n), jnp.float32),
                   jax.ShapeDtypeStruct((p, 1, n), jnp.float32)),
        grid=(p,),
        in_specs=[pl.BlockSpec((1, hw, n), lambda j: (j, 0, 0))],
        out_specs=(pl.BlockSpec((1, 1, n), lambda j: (j, 0, 0)),
                   pl.BlockSpec((1, 1, n), lambda j: (j, 0, 0)),
                   pl.BlockSpec((1, 1, n), lambda j: (j, 0, 0))),
        compiler_params=pltpu.CompilerParams(
            dimension_semantics=("parallel",)),
    )(stacked)
    return cos[:, 0, :], rowabs[:, 0, :], normsq[:, 0, :]   # each (P, N)


# --------------------------------------------------------------------------
# Wrapper reproducing SeparateAngleLoss.forward (first call, empty last_w).
# --------------------------------------------------------------------------
def separate_angle_loss(output, target, params, args):
    total = cross_entropy_pallas(output, target)                  # _cost

    # --- args.var: angle reg over every 4-D conv weight (batched by shape) --
    if args["var"] != 0.0:
        conv_groups = {}
        for name, w in params.items():
            if w.ndim == 4:
                conv_groups.setdefault(tuple(w.shape), []).append(w)
        if conv_groups:
            var_sum = 0.0
            for (o, i, kh, kw), ws in conv_groups.items():
                stacked = jnp.stack(
                    [jnp.transpose(w, (2, 3, 1, 0)).reshape(kh * kw, i, o)
                     for w in ws]).astype(jnp.float32)            # (P, K, I, O)
                cos = jnp.clip(conv_angle_cos_pallas(stacked), -1.0, 1.0)
                var_sum = var_sum + jnp.sum(1.0 - jnp.arccos(cos) / PI)
            total = total + var_sum * args["var"]

    # --- FilterSkeleton stats: one batched pallas_call per distinct shape ---
    fs_items = [(k, v) for k, v in params.items() if "FilterSkeleton" in k]
    fs_groups = {}
    for name, w in fs_items:
        fs_groups.setdefault(tuple(w.shape), []).append(w)
    fs_stats = []                                                  # [(cos, rowabs, normsq)]
    for (n, kh, kw), ws in fs_groups.items():
        stacked = jnp.stack(
            [w.reshape(n, kh * kw).T for w in ws]).astype(jnp.float32)  # (P, HW, N)
        fs_stats.append(fs_stats_pallas(stacked))

    # --- args.var2: angle reg over FilterSkeleton weights --------------------
    if args["var2"] != 0 and fs_stats:
        var2_sum = 0.0
        for cos, _, _ in fs_stats:
            cosc = jnp.clip(cos, -1.0, 1.0)
            var2_sum = var2_sum + jnp.sum(1.0 - jnp.arccos(cosc) / PI)
        total = total + var2_sum * args["var2"]

    # --- args.l1_value: the original module computes _l1_reg (and prints the
    #     weights) but NEVER adds it to the returned loss — faithful no-op. ---
    if args["l1_value"] != 0.0:
        pass

    # --- args.l2_value: sum of Frobenius norms --------------------------------
    if args["l2_value"] != 0.0 and fs_stats:
        l2 = 0.0
        for _, _, normsq in fs_stats:
            l2 = l2 + jnp.sum(jnp.sqrt(jnp.sum(normsq, axis=1)))
        total = total + args["l2_value"] * l2

    # --- args.gl_a: group lasso ------------------------------------------------
    if args["gl_a"] != 0.0 and fs_stats:
        gl = 0.0
        for _, rowabs, _ in fs_stats:
            gl = gl + jnp.sum(jnp.sqrt(jnp.sum(jnp.square(rowabs), axis=1)))
        total = total + args["gl_a"] * gl

    # --- args.prop: first-call branch (last_w empty) ---------------------------
    if args["prop"] != 0.0 and fs_stats:
        pr = 0.0
        for _, rowabs, _ in fs_stats:
            now_g = jnp.sum(jnp.sqrt(jnp.square(rowabs)), axis=1)   # (P,)
            now_l1 = jnp.sum(rowabs, axis=1)                        # (P,)
            pr = pr + jnp.sum(args["prop"] * now_g + args["prop"] * now_l1)
        total = total + pr

    return total


# --------------------------------------------------------------------------
# Pure-JAX reference mirroring the torch math (correctness check only).
# --------------------------------------------------------------------------
def reference_loss(output, target, params, args):
    n = output.shape[0]
    logp = jax.nn.log_softmax(output, axis=-1)
    total = -jnp.mean(logp[jnp.arange(n), target])
    if args["var"] != 0.0:
        cos1 = 0.0
        for _, w in params.items():
            if w.ndim == 4:
                fm = jnp.mean(w, axis=(0, 2, 3))
                M = jnp.ones_like(w) * fm[None, :, None, None]
                fn = jnp.sqrt(jnp.sum(w ** 2, axis=(1, 2, 3)))
                fmn = jnp.sqrt(jnp.sum(M ** 2, axis=(1, 2, 3)))
                dot = jnp.sum(w * M, axis=(1, 2, 3))
                cos = jnp.clip(dot / (fn * fmn + 1e-8), -1.0, 1.0)
                cos1 = cos1 + jnp.sum(1 - jnp.arccos(cos) / PI) * args["var"]
        total = total + cos1
    fs_items = [(k, v) for k, v in params.items() if "FilterSkeleton" in k]
    if args["var2"] != 0:
        cos2 = 0.0
        for _, w in fs_items:
            m = jnp.mean(w, axis=0)
            M = jnp.ones_like(w) * m[None]
            fn = jnp.sqrt(jnp.sum(w ** 2, axis=(1, 2)))
            fmn = jnp.sqrt(jnp.sum(M ** 2, axis=(1, 2)))
            dot = jnp.sum(w * M, axis=(1, 2))
            cos = jnp.clip(dot / (fn * fmn + 1e-7), -1.0, 1.0)
            cos2 = cos2 + jnp.sum(1 - jnp.arccos(cos) / PI) * args["var2"]
        total = total + cos2
    if args["l2_value"] != 0.0:
        total = total + args["l2_value"] * jnp.sum(
            jnp.stack([jnp.sqrt(jnp.sum(w ** 2)) for _, w in fs_items]))
    if args["gl_a"] != 0.0:
        terms = []
        for _, w in fs_items:
            gg = jnp.square(jnp.sum(jnp.abs(w), axis=(1, 2)))
            terms.append(jnp.sum(jnp.sqrt(jnp.sum(gg, axis=0))) * args["gl_a"])
        total = total + jnp.sum(jnp.stack(terms))
    if args["prop"] != 0.0:
        terms = []
        for _, w in fs_items:
            now_g = jnp.sum(jnp.sqrt(jnp.square(jnp.sum(jnp.abs(w), axis=(1, 2)))))
            now_l1 = jnp.sum(jnp.abs(w))
            terms.append(args["prop"] * now_g + args["prop"] * now_l1)
        total = total + jnp.sum(jnp.stack(terms))
    return total


if __name__ == "__main__":
    key = jax.random.PRNGKey(0)
    ks = jax.random.split(key, 8)

    N, C = 8, 16                              # batch, classes
    output = jax.random.normal(ks[0], (N, C), dtype=jnp.float32)
    target = jax.random.randint(ks[1], (N,), 0, C, dtype=jnp.int32)

    # deterministic synthetic "model" parameters (two conv shapes, two FS shapes;
    # conv1/conv3 FilterSkeletons share a shape to exercise the batched grid).
    params = {
        "conv1.weight": 0.1 * jax.random.normal(ks[2], (8, 4, 3, 3), jnp.float32),
        "conv2.weight": 0.1 * jax.random.normal(ks[3], (16, 8, 3, 3), jnp.float32),
        "conv1.FilterSkeleton": 0.5 * jax.random.normal(ks[4], (8, 3, 3), jnp.float32) + 1.0,
        "conv2.FilterSkeleton": 0.5 * jax.random.normal(ks[5], (16, 3, 3), jnp.float32) + 1.0,
        "conv3.FilterSkeleton": 0.5 * jax.random.normal(ks[6], (8, 3, 3), jnp.float32) + 1.0,
    }

    args = dict(var=0.1, var2=0.05, l1_value=0.0, l2_value=0.01,
                gl_a=0.001, prop=0.002)

    got = jax.block_until_ready(separate_angle_loss(output, target, params, args))
    want = jax.block_until_ready(reference_loss(output, target, params, args))

    assert abs(float(got) - float(want)) < 5e-4, (float(got), float(want))
    print("KERNEL_OK")
</pallas_src>

<mosaic_0001>
module attributes {stable_mosaic.version = 11 : i64} {
  func.func @_ce_kernel(%arg0: i32, %arg1: memref<8x1xi32, #tpu.memory_space<vmem>>, %arg2: memref<8x16xf32, #tpu.memory_space<vmem>>, %arg3: memref<1x1xf32, #tpu.memory_space<vmem>>) attributes {dimension_semantics = [#tpu.dimension_semantics<arbitrary>], iteration_bounds = array<i64: 1>, scalar_prefetch = 0 : i64, scratch_operands = 0 : i64, tpu.core_type = #tpu.core_type<tc>, window_params = [{transform_indices = @transform_0, window_bounds = array<i64: 8, 1>}, {transform_indices = @transform_1, window_bounds = array<i64: 8, 16>}, {pipeline_mode = #tpu.pipeline_mode<synchronous>, transform_indices = @transform_2, window_bounds = array<i64: 1, 1>}]} {
    %c0_i32 = arith.constant 0 : i32
    %0 = arith.cmpi eq, %arg0, %c0_i32 : i32
    %1 = arith.extui %0 : i1 to i32
    %c0_i32_0 = arith.constant 0 : i32
    %2 = arith.cmpi ne, %1, %c0_i32_0 : i32
    scf.if %2 {
      %cst_15 = arith.constant 0.000000e+00 : f32
      %40 = vector.broadcast %cst_15 : f32 to vector<1x1xf32>
      %c0_16 = arith.constant 0 : index
      %c0_17 = arith.constant 0 : index
      %41 = vector.load %arg3[%c0_16, %c0_17] : memref<1x1xf32, #tpu.memory_space<vmem>>, vector<1x1xf32>
      tpu.vector_store %arg3[%c0_16, %c0_17], %40 {strides = array<i32>} : memref<1x1xf32, #tpu.memory_space<vmem>>, vector<1x1xf32>,
    } else {
    }
    %c0 = arith.constant 0 : index
    %c0_1 = arith.constant 0 : index
    %3 = vector.load %arg2[%c0, %c0_1] : memref<8x16xf32, #tpu.memory_space<vmem>>, vector<8x16xf32>
    %c0_2 = arith.constant 0 : index
    %c0_3 = arith.constant 0 : index
    %4 = vector.load %arg1[%c0_2, %c0_3] : memref<8x1xi32, #tpu.memory_space<vmem>>, vector<8x1xi32>
    %5 = tpu.iota {dimensions = array<i32: 1>} : vector<8x16xi32>
    %6 = vector.broadcast %4 : vector<8x1xi32> to vector<8x16xi32>
    %7 = arith.cmpi eq, %5, %6 : vector<8x16xi32>
    %cst = arith.constant 0.000000e+00 : f32
    %8 = vector.broadcast %cst : f32 to vector<8x16xf32>
    %9 = arith.select %7, %3, %8 : vector<8x16xi1>, vector<8x16xf32>
    %cst_4 = arith.constant dense<0.000000e+00> : vector<8xf32>
    %10 = vector.multi_reduction <add>, %9, %cst_4 [1] : vector<8x16xf32> to vector<8xf32>
    %11 = vector.shape_cast %10 : vector<8xf32> to vector<8x1xf32>
    %cst_5 = arith.constant dense<0xFF800000> : vector<8xf32>
    %12 = vector.multi_reduction <maximumf>, %3, %cst_5 [1] : vector<8x16xf32> to vector<8xf32>
    %13 = vector.shape_cast %12 : vector<8xf32> to vector<8x1xf32>
    %14 = vector.broadcast %13 : vector<8x1xf32> to vector<8x16xf32>
    %15 = arith.subf %3, %14 : vector<8x16xf32>
    %16 = math.exp %15 : vector<8x16xf32>
    %cst_6 = arith.constant dense<0.000000e+00> : vector<8xf32>
    %17 = vector.multi_reduction <add>, %16, %cst_6 [1] : vector<8x16xf32> to vector<8xf32>
    %18 = vector.shape_cast %17 : vector<8xf32> to vector<8x1xf32>
    %19 = math.log %18 : vector<8x1xf32>
    %20 = arith.addf %13, %19 : vector<8x1xf32>
    %21 = tpu.iota {dimensions = array<i32: 0>} : vector<8x1xi32>
    %c8_i32 = arith.constant 8 : i32
    %22 = arith.muli %arg0, %c8_i32 : i32
    %23 = vector.broadcast %22 : i32 to vector<8x1xi32>
    %24 = arith.addi %21, %23 : vector<8x1xi32>
    %c8_i32_7 = arith.constant 8 : i32
    %25 = vector.broadcast %c8_i32_7 : i32 to vector<8x1xi32>
    %26 = arith.cmpi slt, %24, %25 : vector<8x1xi32>
    %27 = arith.subf %20, %11 : vector<8x1xf32>
    %cst_8 = arith.constant 0.000000e+00 : f32
    %28 = vector.broadcast %cst_8 : f32 to vector<8x1xf32>
    %29 = arith.select %26, %27, %28 : vector<8x1xi1>, vector<8x1xf32>
    %c0_9 = arith.constant 0 : index
    %c0_10 = arith.constant 0 : index
    %30 = vector.load %arg3[%c0_9, %c0_10] : memref<1x1xf32, #tpu.memory_space<vmem>>, vector<1x1xf32>
    %31 = vector.shape_cast %29 : vector<8x1xf32> to vector<1x8x1xf32>
    %cst_11 = arith.constant dense<0.000000e+00> : vector<1xf32>
    %32 = vector.multi_reduction <add>, %31, %cst_11 [1, 2] : vector<1x8x1xf32> to vector<1xf32>
    %33 = vector.shape_cast %32 : vector<1xf32> to vector<1x1x1xf32>
    %34 = vector.extract %33[0, 0, 0] : f32 from vector<1x1x1xf32>
    %35 = vector.broadcast %34 : f32 to vector<1x1xf32>
    %cst_12 = arith.constant 8.000000e+00 : f32
    %36 = vector.broadcast %cst_12 : f32 to vector<1x1xf32>
    %37 = arith.divf %35, %36 : vector<1x1xf32>
    %38 = arith.addf %30, %37 : vector<1x1xf32>
    %c0_13 = arith.constant 0 : index
    %c0_14 = arith.constant 0 : index
    %39 = vector.load %arg3[%c0_13, %c0_14] : memref<1x1xf32, #tpu.memory_space<vmem>>, vector<1x1xf32>
    tpu.vector_store %arg3[%c0_13, %c0_14], %38 {strides = array<i32>} : memref<1x1xf32, #tpu.memory_space<vmem>>, vector<1x1xf32>,
    return
  }
  func.func @transform_0(%arg0: i32) -> (i32, i32) {
    %c0_i32 = arith.constant 0 : i32
    %c0_i32_0 = arith.constant 0 : i32
    return %arg0, %c0_i32 : i32, i32
  }
  func.func @transform_1(%arg0: i32) -> (i32, i32) {
    %c0_i32 = arith.constant 0 : i32
    %c0_i32_0 = arith.constant 0 : i32
    return %arg0, %c0_i32 : i32, i32
  }
  func.func @transform_2(%arg0: i32) -> (i32, i32) {
    %c0_i32 = arith.constant 0 : i32
    %c0_i32_0 = arith.constant 0 : i32
    %c0_i32_1 = arith.constant 0 : i32
    return %c0_i32, %c0_i32_0 : i32, i32
  }
}

</mosaic_0001>

<bundles_post_ra>
// kernel: tpu_custom_call.1
= control target key start
LH: loop header
LB: loop body
LE: loop exit
PB: predicated region body
PF: predicated region fallthrough
CT: control target
= control target key end

     0   :  { %vm27_vm0 = vcmask 130048   ;;  %s163_s0 = inlined_call_operand.vmem [shape: s32[8,1], index: 0, kind: input, shape index: {}]   ;;  %s164_s1 = inlined_call_operand.vmem [shape: f32[8,16], index: 1, kind: input, shape index: {}]   ;;  %s165_s2 = inlined_call_operand.hbm [shape: f32[1,1], index: 2, kind: output, shape index: {}]  }
   0x1   :  { %v18_v0 = vld [vmem:[%s164_s1] sm:$0xff] }
   0x2   :  { %7 = vsyncpa [#allocation3], 0  ;;  %v31_v1 = vsel %vm27_vm0, %v18_v0, -inf  ;;  %v130_v2 = vmov 0   ;;  %v19_v3 = vld [vmem:[%s163_s0] sm:$0xff]  ;;  %v20_v9 = vlaneseq  ;;  %vm52_vm2 = vcmask 7168  }
   0x3   :  { %97 = vset.pattern.permute.xlu0 %v130_v2  ;;  %vm16_vm3 = vcmask 0   ;;  %v131_v21 = vmov 0.0   ;;  %v132_v29 = vmov 8.0   ;;  %s133_s1 = smov [#allocation2]   ;;  %s82_s16 = sshll.u32 %s165_s2, 4  ;;  %s83_s16 = int_to_ptr.hbm [resolvable:$true] %s82_s16 }
   0x4   :  { %32 = vmax.xlane.f32.xlu0 %v31_v1  ;;  %v21_v10 = vand.u32 127, %v20_v9  ;;  %17 = vst.msk [vmem:[#allocation2] sm:$0x1] %vm16_vm3, %v131_v21  ;;  %s80_s13 = sshll.u32 %s133_s1, 4  ;;  %s81_s13 = int_to_ptr.vmem [resolvable:$true] %s80_s13 }
   0xb   :  { %v51_v36 = vld [vmem:[#allocation2] sm:$0x1] }
  0x18   :  { %23 = vperm.xlu0 %97, %v19_v3  }
  0x77   :  { %v33_v4 = vpop.xlane.xlu0 %32 }
  0x78   :  { %v34_v5 = vsub.f32 %v18_v0, %v33_v4 }
  0x7a   :  { %v35_v6 = vmul.f32 1.442695, %v34_v5 }
  0x7c   :  { %98 = vpow2.f32 %v35_v6 }
  0x82   :  { %v99_v7 = vpop.eup %98 }
  0x83   :  { %v37_v8 = vsel %vm27_vm0, %v99_v7, 0.0 }
  0x84   :  { %38 = vadd.xlane.f32.xlu1 %v37_v8 }
  0x8a   :  { %v24_v11 = vpop.permute.xlu0 %23 }
  0x8b   :  { %vm25_vm1 = vcmp.eq.s32.totalorder %v21_v10, %v24_v11 }
  0x8c   :  { %v26_v12 = vsel %vm25_vm1, %v18_v0, 0.0 }
  0x8d   :  { %v28_v13 = vsel %vm27_vm0, %v26_v12, 0.0 }
  0x8e   :  { %29 = vadd.xlane.f32.xlu1 %v28_v13 }
  0xf7   :  { %v39_v14 = vpop.xlane.xlu1 %38 }
  0xf8   :  { %100 = vlog2.f32 %v39_v14 }
  0xf9   :  { %102 = vrcp.f32 %v132_v29 }
  0xfe   :  { %v101_v15 = vpop.eup %100 }
  0xff   :  { %v41_v16 = vmul.f32 0.6931472, %v101_v15  ;;  %v103_v30 = vpop.eup %102 }
 0x100   :  { %v65_v31 = vmul.f32 8.0, %v103_v30  ;;  %vm69_vm4 = vweird.f32 %v103_v30 }
 0x101   :  { %v42_v17 = vadd.f32 %v41_v16, %v33_v4  ;;  %v30_v18 = vpop.xlane.xlu1 %29 }
 0x102   :  { %v66_v32 = vsub.f32 1.0, %v65_v31 }
 0x103   :  { %v49_v19 = vsub.f32 %v42_v17, %v30_v18 }
 0x104   :  { %v67_v33 = vmul.f32 %v103_v30, %v66_v32 }
 0x105   :  { %v53_v20 = vsel %vm52_vm2, %v49_v19, 0.0 }
 0x106   :  { %54 = vadd.xlane.f32.xlu2 %v53_v20  ;;  %v68_v34 = vadd.f32 %v103_v30, %v67_v33 }
 0x108   :  { %v70_v35 = vsel %vm69_vm4, %v103_v30, %v68_v34 }
 0x179   :  { %v55_v22 = vpop.xlane.xlu2 %54 }
 0x17a   :  { %v56_v23 = vrot.slane %v55_v22, 4 }
 0x17c   :  { %v57_v24 = vadd.f32 %v56_v23, %v55_v22 }
 0x17e   :  { %v58_v25 = vrot.slane %v57_v24, 2 }
 0x180   :  { %v59_v26 = vadd.f32 %v58_v25, %v57_v24 }
 0x182   :  { %v60_v27 = vrot.slane %v59_v26, 1 }
 0x184   :  { %v61_v28 = vadd.f32 %v60_v27, %v59_v26 }
 0x186   :  { %91 = vpush %v61_v28 }
 0x1b7   :  { %s92_s0 = spop %91 }
 0x1b8   :  { %v63_v37 = vstv %s92_s0 }
 0x1b9   :  { %v71_v38 = vmul.f32 %v70_v35, %v63_v37 }
 0x1bb   :  { %v72_v39 = vadd.f32 %v71_v38, %v51_v36 }
 0x1bd   :  { %74 = vst.msk [vmem:[#allocation2] sm:$0x1] %vm16_vm3, %v72_v39 }
 0x1be   :  { %85 = dma.vmem_to_hbm [thread:$0]  %s81_s13, 16, %s83_s16, [#allocation3]  }
 0x1bf   :  { %128 = dma.done.wait [#allocation3], 16  }
 0x1c0   :  { %129 = vsyncadd [#allocation3], 4294967280 }
 0x1c1   :  { %90 = vsyncpa [#allocation3], 1 }

</bundles_post_ra>
